<compile_context>
chip_gen: v5e
topology: v5e:2x2
jax: 0.10.0
libtpu: 0.0.40
codegen_flags: <defaults>
</compile_context>

<pallas_src>
import math
from functools import partial

import jax
import jax.numpy as jnp
from jax.experimental import pallas as pl
from jax.experimental.pallas import tpu as pltpu


def _round_up(x, m):
    return (x + m - 1) // m * m


def _pad2(a, rows, cols, dtype):
    """Cast + zero-pad a 2-D array, copying only when actually needed."""
    if a.dtype != dtype:
        a = a.astype(dtype)
    pr, pc = rows - a.shape[0], cols - a.shape[1]
    if pr or pc:
        a = jnp.pad(a, ((0, pr), (0, pc)))
    return a


# ---------------------------------------------------------------------------
# Kernel 1: support = X @ W   (computed once, tiled over row tiles)
# ---------------------------------------------------------------------------
def _support_kernel(x_ref, w_ref, s_ref):
    s_ref[...] = jnp.dot(
        x_ref[...], w_ref[...], preferred_element_type=jnp.float32
    ).astype(s_ref.dtype)


# ---------------------------------------------------------------------------
# Kernel 2: out = adj @ support + bias   (block-sparse tiled reduction)
# ---------------------------------------------------------------------------
def _aggregate_kernel(nnz_ref, cols_ref, adj_ref, s_ref, b_ref, o_ref,
                      acc_ref, *, t, n_red, resident):
    i = pl.program_id(0)
    k = pl.program_id(1)

    @pl.when(k == 0)
    def _():
        acc_ref[...] = jnp.zeros_like(acc_ref)

    # Only the first nnz[i] steps of this row carry real (nonzero) adjacency
    # blocks.  The remaining steps repeat the previous block index, so the
    # pipeline elides their adj/support DMAs and we skip the MXU work here.
    @pl.when(k < nnz_ref[i])
    def _():
        if resident:
            col = cols_ref[i * n_red + k]
            start = pl.multiple_of(col * t, t)
            s_blk = s_ref[pl.ds(start, t), :]
        else:
            s_blk = s_ref[...]
        # support is stored f32; cast to bf16 only at the MXU input.
        acc_ref[...] += jnp.dot(
            adj_ref[...], s_blk.astype(jnp.bfloat16),
            preferred_element_type=jnp.float32)

    @pl.when(k == pl.num_programs(1) - 1)
    def _():
        # Bias added exactly once, in f32, on the final reduction step.
        o_ref[...] = (acc_ref[...] + b_ref[...]).astype(o_ref.dtype)


def graph_convolution(x, adj, weight, bias, *, tile=None,
                      resident_support_bytes=16 * 1024 * 1024):
    """GCN forward: adj @ (x @ weight) + bias.

    x:      (N, F_in)
    adj:    (N, N) dense (row-normalized) adjacency
    weight: (F_in, F_out)
    bias:   (F_out,) or None
    Returns (N, F_out) float32.
    """
    N, f_in = x.shape
    f_out = weight.shape[1]

    # ---- tiled / padded geometry ---------------------------------------
    if tile is None:
        if N >= 512:
            tile = 512
        elif N >= 256:
            tile = 256
        else:
            tile = 128
    t = tile
    n_p = _round_up(N, t)
    fin_p = _round_up(f_in, 128)          # lane-dense contraction dim
    fout_p = _round_up(f_out, 128)        # lane-dense output features

    n_row = n_p // t
    n_red = n_p // t

    # ---- cast / pad operands (copies only when ragged or dtype change) -
    x_p = _pad2(x, n_p, fin_p, jnp.bfloat16)
    adj_p = _pad2(adj, n_p, n_p, jnp.bfloat16)
    w_p = _pad2(weight, fin_p, fout_p, jnp.bfloat16)
    if bias is None:
        b_p = jnp.zeros((1, fout_p), jnp.float32)
    else:
        b_p = _pad2(bias.reshape(1, -1), 1, fout_p, jnp.float32)

    # ---- kernel 1: support = X @ W (computed once, f32 result) ---------
    support = pl.pallas_call(
        _support_kernel,
        out_shape=jax.ShapeDtypeStruct((n_p, fout_p), jnp.float32),
        grid_spec=pltpu.PrefetchScalarGridSpec(
            num_scalar_prefetch=0,
            grid=(n_row,),
            in_specs=[
                pl.BlockSpec((t, fin_p), lambda i: (i, 0)),
                pl.BlockSpec((fin_p, fout_p), lambda i: (0, 0)),
            ],
            out_specs=pl.BlockSpec((t, fout_p), lambda i: (i, 0)),
        ),
        compiler_params=pltpu.CompilerParams(
            dimension_semantics=("parallel",)),
    )(x_p, w_p)

    # ---- block-sparsity metadata (single bool pass over the bf16 adj
    #      tensor the kernel actually reads; no f32 copy, no padded-copy) -
    blk_nz = jnp.any(
        adj_p.reshape(n_row, t, n_red, t) != 0, axis=(1, 3))     # (n_row, n_red)
    nnz = jnp.sum(blk_nz, axis=1).astype(jnp.int32)              # (n_row,)
    # Nonzero block columns first (ascending), then zero-block columns.
    order = jnp.argsort(jnp.logical_not(blk_nz), axis=1).astype(jnp.int32)
    kk = jnp.arange(n_red, dtype=jnp.int32)[None, :]
    clamp = jnp.minimum(kk, jnp.maximum(nnz[:, None] - 1, 0))
    # Steps beyond nnz[i] repeat the last valid column -> their DMAs are
    # elided by the pipeline (same block index as the previous step).
    col_ids = jnp.take_along_axis(order, clamp, axis=1).astype(jnp.int32)
    cols_flat = col_ids.reshape(-1)                              # (n_row*n_red,)

    # ---- support residency decision (VMEM budget, v7x-safe) ------------
    resident = (n_p * fout_p * 4) <= resident_support_bytes
    if resident:
        support_spec = pl.BlockSpec(
            (n_p, fout_p), lambda i, k, nnz_r, cols_r: (0, 0))
    else:
        # Streaming fallback: data-dependent block fetch (also DMA-skipped
        # on repeated indices).
        support_spec = pl.BlockSpec(
            (t, fout_p),
            lambda i, k, nnz_r, cols_r: (cols_r[i * n_red + k], 0))

    # ---- kernel 2: out = adj @ support + bias (block-sparse reduction) -
    out_p = pl.pallas_call(
        partial(_aggregate_kernel, t=t, n_red=n_red, resident=resident),
        out_shape=jax.ShapeDtypeStruct((n_p, fout_p), jnp.float32),
        grid_spec=pltpu.PrefetchScalarGridSpec(
            num_scalar_prefetch=2,
            grid=(n_row, n_red),
            in_specs=[
                pl.BlockSpec(
                    (t, t),
                    lambda i, k, nnz_r, cols_r: (i, cols_r[i * n_red + k])),
                support_spec,
                pl.BlockSpec((1, fout_p), lambda i, k, nnz_r, cols_r: (0, 0)),
            ],
            out_specs=pl.BlockSpec(
                (t, fout_p), lambda i, k, nnz_r, cols_r: (i, 0)),
            scratch_shapes=[pltpu.VMEM((t, fout_p), jnp.float32)],
        ),
        compiler_params=pltpu.CompilerParams(
            dimension_semantics=("parallel", "arbitrary")),
    )(nnz, cols_flat, adj_p, support, b_p)

    return out_p[:N, :f_out]


if __name__ == "__main__":
    # Small shapes consistent with the module: N nodes, in_features -> out_features.
    N, in_features, out_features = 64, 32, 16

    key = jax.random.PRNGKey(0)
    k_x, k_adj, k_w, k_b = jax.random.split(key, 4)

    # Deterministic parameter init matching reset_parameters():
    #   stdv = 1 / sqrt(out_features); uniform(-stdv, stdv)
    stdv = 1.0 / math.sqrt(out_features)
    weight = jax.random.uniform(k_w, (in_features, out_features),
                                minval=-stdv, maxval=stdv, dtype=jnp.float32)
    bias = jax.random.uniform(k_b, (out_features,),
                              minval=-stdv, maxval=stdv, dtype=jnp.float32)

    # Node features and a (dense) row-normalized adjacency with self-loops.
    x = jax.random.normal(k_x, (N, in_features), dtype=jnp.float32)
    adj_raw = (jax.random.uniform(k_adj, (N, N)) < 0.1).astype(jnp.float32)
    adj = adj_raw + jnp.eye(N, dtype=jnp.float32)
    adj = adj / jnp.sum(adj, axis=1, keepdims=True)

    gcn = jax.jit(graph_convolution)
    out = gcn(x, adj, weight, bias)
    out = jax.block_until_ready(out)

    # Reference in plain JAX (same semantics as torch.mm / torch.spmm).
    # Tolerance loosened because adj and the MXU inputs are bf16
    # (accumulation and bias add stay f32).
    ref = adj @ (x @ weight) + bias
    assert out.shape == (N, out_features)
    assert jnp.allclose(out, ref, atol=3e-2, rtol=3e-2), float(
        jnp.max(jnp.abs(out - ref)))

    print("KERNEL_OK")
</pallas_src>

<mosaic_0001>
module attributes {stable_mosaic.version = 11 : i64} {
  func.func @_support_kernel(%arg0: i32, %arg1: memref<128x128xbf16, #tpu.memory_space<vmem>>, %arg2: memref<128x128xbf16, #tpu.memory_space<vmem>>, %arg3: memref<128x128xf32, #tpu.memory_space<vmem>>) attributes {dimension_semantics = [#tpu.dimension_semantics<parallel>], iteration_bounds = array<i64: 1>, scalar_prefetch = 0 : i64, scratch_operands = 0 : i64, tpu.core_type = #tpu.core_type<tc>, window_params = [{transform_indices = @transform_0, window_bounds = array<i64: 128, 128>}, {pipeline_mode = #tpu.pipeline_mode<synchronous>, transform_indices = @transform_1, window_bounds = array<i64: 128, 128>}, {transform_indices = @transform_2, window_bounds = array<i64: 128, 128>}]} {
    %c0 = arith.constant 0 : index
    %c0_0 = arith.constant 0 : index
    %0 = vector.load %arg1[%c0, %c0_0] : memref<128x128xbf16, #tpu.memory_space<vmem>>, vector<128x128xbf16>
    %c0_1 = arith.constant 0 : index
    %c0_2 = arith.constant 0 : index
    %1 = vector.load %arg2[%c0_1, %c0_2] : memref<128x128xbf16, #tpu.memory_space<vmem>>, vector<128x128xbf16>
    %cst = arith.constant dense<0.000000e+00> : vector<128x128xf32>
    %2 = tpu.matmul %0, %1, %cst {dimension_numbers = #tpu.dot_dimension_numbers<[1], [0], [0], [1], [0, 0, 1, 1], [], []>} : vector<128x128xbf16>, vector<128x128xbf16>, vector<128x128xf32> -> vector<128x128xf32>
    %c0_3 = arith.constant 0 : index
    %c0_4 = arith.constant 0 : index
    %3 = vector.load %arg3[%c0_3, %c0_4] : memref<128x128xf32, #tpu.memory_space<vmem>>, vector<128x128xf32>
    tpu.vector_store %arg3[%c0_3, %c0_4], %2 {strides = array<i32>} : memref<128x128xf32, #tpu.memory_space<vmem>>, vector<128x128xf32>,
    return
  }
  func.func @transform_0(%arg0: i32) -> (i32, i32) {
    %c0_i32 = arith.constant 0 : i32
    %c0_i32_0 = arith.constant 0 : i32
    return %arg0, %c0_i32 : i32, i32
  }
  func.func @transform_1(%arg0: i32) -> (i32, i32) {
    %c0_i32 = arith.constant 0 : i32
    %c0_i32_0 = arith.constant 0 : i32
    %c0_i32_1 = arith.constant 0 : i32
    return %c0_i32, %c0_i32_0 : i32, i32
  }
  func.func @transform_2(%arg0: i32) -> (i32, i32) {
    %c0_i32 = arith.constant 0 : i32
    %c0_i32_0 = arith.constant 0 : i32
    return %arg0, %c0_i32 : i32, i32
  }
}

module attributes {stable_mosaic.version = 11 : i64} {
  func.func @_aggregate_kernel(%arg0: i32, %arg1: i32, %arg2: memref<1xi32, #tpu.memory_space<smem>>, %arg3: memref<1xi32, #tpu.memory_space<smem>>, %arg4: memref<128x128xbf16, #tpu.memory_space<vmem>>, %arg5: memref<128x128xf32, #tpu.memory_space<vmem>>, %arg6: memref<1x128xf32, #tpu.memory_space<vmem>>, %arg7: memref<128x128xf32, #tpu.memory_space<vmem>>, %arg8: memref<128x128xf32, #tpu.memory_space<vmem>>) attributes {dimension_semantics = [#tpu.dimension_semantics<parallel>, #tpu.dimension_semantics<arbitrary>], iteration_bounds = array<i64: 1, 1>, scalar_prefetch = 2 : i64, scratch_operands = 1 : i64, tpu.core_type = #tpu.core_type<tc>, window_params = [{transform_indices = @transform_0, window_bounds = array<i64: 128, 128>}, {pipeline_mode = #tpu.pipeline_mode<synchronous>, transform_indices = @transform_1, window_bounds = array<i64: 128, 128>}, {pipeline_mode = #tpu.pipeline_mode<synchronous>, transform_indices = @transform_2, window_bounds = array<i64: 1, 128>}, {transform_indices = @transform_3, window_bounds = array<i64: 128, 128>}]} {
    %c0_i32 = arith.constant 0 : i32
    %0 = arith.cmpi eq, %arg1, %c0_i32 : i32
    %1 = arith.extui %0 : i1 to i32
    %c0_i32_0 = arith.constant 0 : i32
    %2 = arith.cmpi ne, %1, %c0_i32_0 : i32
    scf.if %2 {
      %cst = arith.constant 0.000000e+00 : f32
      %11 = vector.broadcast %cst : f32 to vector<128x128xf32>
      %c0 = arith.constant 0 : index
      %c0_4 = arith.constant 0 : index
      %12 = vector.load %arg8[%c0, %c0_4] : memref<128x128xf32, #tpu.memory_space<vmem>>, vector<128x128xf32>
      tpu.vector_store %arg8[%c0, %c0_4], %11 {strides = array<i32>} : memref<128x128xf32, #tpu.memory_space<vmem>>, vector<128x128xf32>,
    } else {
    }
    %3 = arith.index_cast %arg0 : i32 to index
    %4 = memref.load %arg2[%3] : memref<1xi32, #tpu.memory_space<smem>>
    %5 = arith.cmpi slt, %arg1, %4 : i32
    %6 = arith.extui %5 : i1 to i32
    %c0_i32_1 = arith.constant 0 : i32
    %7 = arith.cmpi ne, %6, %c0_i32_1 : i32
    scf.if %7 {
      %c1_i32 = arith.constant 1 : i32
      %11 = arith.muli %arg0, %c1_i32 : i32
      %12 = arith.addi %11, %arg1 : i32
      %13 = arith.index_cast %12 : i32 to index
      %14 = memref.load %arg3[%13] : memref<1xi32, #tpu.memory_space<smem>>
      %c128_i32 = arith.constant 128 : i32
      %15 = arith.muli %14, %c128_i32 : i32
      %16 = tpu.assume_multiple %15, 128 : i32
      %17 = arith.index_cast %16 : i32 to index
      %c0 = arith.constant 0 : index
      %18 = vector.load %arg5[%17, %c0] : memref<128x128xf32, #tpu.memory_space<vmem>>, vector<128x128xf32>
      %c0_4 = arith.constant 0 : index
      %c0_5 = arith.constant 0 : index
      %19 = vector.load %arg8[%c0_4, %c0_5] : memref<128x128xf32, #tpu.memory_space<vmem>>, vector<128x128xf32>
      %c0_6 = arith.constant 0 : index
      %c0_7 = arith.constant 0 : index
      %20 = vector.load %arg4[%c0_6, %c0_7] : memref<128x128xbf16, #tpu.memory_space<vmem>>, vector<128x128xbf16>
      %21 = arith.truncf %18 : vector<128x128xf32> to vector<128x128xbf16>
      %cst = arith.constant dense<0.000000e+00> : vector<128x128xf32>
      %22 = tpu.matmul %20, %21, %cst {dimension_numbers = #tpu.dot_dimension_numbers<[1], [0], [0], [1], [0, 0, 1, 1], [], []>} : vector<128x128xbf16>, vector<128x128xbf16>, vector<128x128xf32> -> vector<128x128xf32>
      %23 = arith.addf %19, %22 : vector<128x128xf32>
      %c0_8 = arith.constant 0 : index
      %c0_9 = arith.constant 0 : index
      %24 = vector.load %arg8[%c0_8, %c0_9] : memref<128x128xf32, #tpu.memory_space<vmem>>, vector<128x128xf32>
      tpu.vector_store %arg8[%c0_8, %c0_9], %23 {strides = array<i32>} : memref<128x128xf32, #tpu.memory_space<vmem>>, vector<128x128xf32>,
    } else {
    }
    %c0_i32_2 = arith.constant 0 : i32
    %8 = arith.cmpi eq, %arg1, %c0_i32_2 : i32
    %9 = arith.extui %8 : i1 to i32
    %c0_i32_3 = arith.constant 0 : i32
    %10 = arith.cmpi ne, %9, %c0_i32_3 : i32
    scf.if %10 {
      %c0 = arith.constant 0 : index
      %c0_4 = arith.constant 0 : index
      %11 = vector.load %arg8[%c0, %c0_4] : memref<128x128xf32, #tpu.memory_space<vmem>>, vector<128x128xf32>
      %c0_5 = arith.constant 0 : index
      %c0_6 = arith.constant 0 : index
      %12 = vector.load %arg6[%c0_5, %c0_6] : memref<1x128xf32, #tpu.memory_space<vmem>>, vector<1x128xf32>
      %13 = vector.broadcast %12 : vector<1x128xf32> to vector<128x128xf32>
      %14 = arith.addf %11, %13 : vector<128x128xf32>
      %c0_7 = arith.constant 0 : index
      %c0_8 = arith.constant 0 : index
      %15 = vector.load %arg7[%c0_7, %c0_8] : memref<128x128xf32, #tpu.memory_space<vmem>>, vector<128x128xf32>
      tpu.vector_store %arg7[%c0_7, %c0_8], %14 {strides = array<i32>} : memref<128x128xf32, #tpu.memory_space<vmem>>, vector<128x128xf32>,
    } else {
    }
    return
  }
  func.func @transform_0(%arg0: i32, %arg1: i32, %arg2: memref<1xi32, #tpu.memory_space<smem>>, %arg3: memref<1xi32, #tpu.memory_space<smem>>) -> (i32, i32) {
    %c1_i32 = arith.constant 1 : i32
    %0 = arith.muli %arg0, %c1_i32 : i32
    %1 = arith.addi %0, %arg1 : i32
    %2 = arith.index_cast %1 : i32 to index
    %3 = memref.load %arg3[%2] : memref<1xi32, #tpu.memory_space<smem>>
    %c0_i32 = arith.constant 0 : i32
    return %arg0, %3 : i32, i32
  }
  func.func @transform_1(%arg0: i32, %arg1: i32, %arg2: memref<1xi32, #tpu.memory_space<smem>>, %arg3: memref<1xi32, #tpu.memory_space<smem>>) -> (i32, i32) {
    %c0_i32 = arith.constant 0 : i32
    %c0_i32_0 = arith.constant 0 : i32
    %c0_i32_1 = arith.constant 0 : i32
    return %c0_i32, %c0_i32_0 : i32, i32
  }
  func.func @transform_2(%arg0: i32, %arg1: i32, %arg2: memref<1xi32, #tpu.memory_space<smem>>, %arg3: memref<1xi32, #tpu.memory_space<smem>>) -> (i32, i32) {
    %c0_i32 = arith.constant 0 : i32
    %c0_i32_0 = arith.constant 0 : i32
    %c0_i32_1 = arith.constant 0 : i32
    return %c0_i32, %c0_i32_0 : i32, i32
  }
  func.func @transform_3(%arg0: i32, %arg1: i32, %arg2: memref<1xi32, #tpu.memory_space<smem>>, %arg3: memref<1xi32, #tpu.memory_space<smem>>) -> (i32, i32) {
    %c0_i32 = arith.constant 0 : i32
    %c0_i32_0 = arith.constant 0 : i32
    return %arg0, %c0_i32 : i32, i32
  }
}

</mosaic_0001>

<bundles_post_ra>
// kernel: graph_convolution.2
= control target key start
LH: loop header
LB: loop body
LE: loop exit
PB: predicated region body
PF: predicated region fallthrough
CT: control target
= control target key end

     0   :  { %s423_s1 = inlined_call_operand.vmem [shape: bf16[128,128], index: 1, kind: input, shape index: {}]   ;;  %s424_s0 = inlined_call_operand.vmem [shape: bf16[128,128], index: 0, kind: input, shape index: {}]   ;;  %s425_s2 = inlined_call_operand.vmem [shape: f32[128,128], index: 2, kind: output, shape index: {}]  }
   0x1   :  { %v287_v0 = vld [vmem:[%s423_s1 + $0x38] sm:$0xff]  ;;  %v286_v1 = vld [vmem:[%s423_s1 + $0x30] sm:$0xff]  ;;  %v285_v2 = vld [vmem:[%s423_s1 + $0x28] sm:$0xff] }
   0x2   :  { %139 = vmatpush.bf16.msra.mxu0 %v287_v0  ;;  %288 = vmatpush.bf16.msra.mxu1 %v287_v0  ;;  %v284_v3 = vld [vmem:[%s423_s1 + $0x20] sm:$0xff]  ;;  %v283_v4 = vld [vmem:[%s423_s1 + $0x18] sm:$0xff]  ;;  %v282_v5 = vld [vmem:[%s423_s1 + $0x10] sm:$0xff] }
   0x3   :  { %289 = vmatpush.bf16.msra.mxu2 %v287_v0  ;;  %290 = vmatpush.bf16.msra.mxu3 %v287_v0  ;;  %v281_v6 = vld [vmem:[%s423_s1 + $0x8] sm:$0xff]  ;;  %v280_v7 = vld [vmem:[%s423_s1] sm:$0xff]  ;;  %v274_v9 = vld [vmem:[%s424_s0 + $0x10] sm:$0xff] }
   0x4   :  { %v272_v8 = vld [vmem:[%s424_s0] sm:$0xff]  ;;  %v278_v11 = vld [vmem:[%s424_s0 + $0x30] sm:$0xff]  ;;  %v273_v12 = vld [vmem:[%s424_s0 + $0x8] sm:$0xff] }
   0x5   :  { %v276_v10 = vld [vmem:[%s424_s0 + $0x20] sm:$0xff]  ;;  %v275_v13 = vld [vmem:[%s424_s0 + $0x18] sm:$0xff]  ;;  %v277_v14 = vld [vmem:[%s424_s0 + $0x28] sm:$0xff] }
   0x6   :  { %140 = vmatpush.bf16.msra.mxu0 %v286_v1  ;;  %291 = vmatpush.bf16.msra.mxu1 %v286_v1  ;;  %v279_v15 = vld [vmem:[%s424_s0 + $0x38] sm:$0xff] }
   0x7   :  { %292 = vmatpush.bf16.msra.mxu2 %v286_v1  ;;  %293 = vmatpush.bf16.msra.mxu3 %v286_v1 }
   0xa   :  { %141 = vmatpush.bf16.msra.mxu0 %v285_v2  ;;  %294 = vmatpush.bf16.msra.mxu1 %v285_v2 }
   0xb   :  { %295 = vmatpush.bf16.msra.mxu2 %v285_v2  ;;  %296 = vmatpush.bf16.msra.mxu3 %v285_v2 }
   0xe   :  { %142 = vmatpush.bf16.msra.mxu0 %v284_v3  ;;  %297 = vmatpush.bf16.msra.mxu1 %v284_v3 }
   0xf   :  { %298 = vmatpush.bf16.msra.mxu2 %v284_v3  ;;  %299 = vmatpush.bf16.msra.mxu3 %v284_v3 }
  0x12   :  { %143 = vmatpush.bf16.msra.mxu0 %v283_v4  ;;  %300 = vmatpush.bf16.msra.mxu1 %v283_v4 }
  0x13   :  { %301 = vmatpush.bf16.msra.mxu2 %v283_v4  ;;  %302 = vmatpush.bf16.msra.mxu3 %v283_v4 }
  0x16   :  { %144 = vmatpush.bf16.msra.mxu0 %v282_v5  ;;  %303 = vmatpush.bf16.msra.mxu1 %v282_v5 }
  0x17   :  { %304 = vmatpush.bf16.msra.mxu2 %v282_v5  ;;  %305 = vmatpush.bf16.msra.mxu3 %v282_v5 }
  0x1a   :  { %145 = vmatpush.bf16.msra.mxu0 %v281_v6  ;;  %306 = vmatpush.bf16.msra.mxu1 %v281_v6 }
  0x1b   :  { %307 = vmatpush.bf16.msra.mxu2 %v281_v6  ;;  %308 = vmatpush.bf16.msra.mxu3 %v281_v6 }
  0x1e   :  { %146 = vmatpush.bf16.msra.mxu0 %v280_v7  ;;  %309 = vmatpush.bf16.msra.mxu1 %v280_v7 }
  0x1f   :  { %310 = vmatpush.bf16.msra.mxu2 %v280_v7  ;;  %311 = vmatpush.bf16.msra.mxu3 %v280_v7 }
  0x21   :  { %147 = vmatmul.bf16.vlgmr.msra.gmra.mxu0 %v272_v8  ;;  %157 = vmatmul.bf16.vlgmr.msra.gmra.mxu1 %v274_v9 }
  0x22   :  { %167 = vmatmul.bf16.vlgmr.msra.gmra.mxu2 %v276_v10  ;;  %177 = vmatmul.bf16.vlgmr.msra.gmra.mxu3 %v278_v11 }
  0x31   :  { %152 = vmatmul.bf16.gmra.mxu0 %v273_v12  ;;  %162 = vmatmul.bf16.gmra.mxu1 %v275_v13 }
  0x32   :  { %172 = vmatmul.bf16.gmra.mxu2 %v277_v14  ;;  %182 = vmatmul.bf16.gmra.mxu3 %v279_v15 }
  0x9e   :  { %v148_v16 = vpop.f32.mrf.mxu0  ;;  %v158_v17 = vpop.f32.mrf.mxu1 }
  0x9f   :  { %188 = vst [vmem:[%s425_s2] sm:$0xff] %v148_v16 }
  0xa0   :  { %192 = vst [vmem:[%s425_s2 + $0x20] sm:$0xff] %v158_v17 }
  0xa5   :  { %v168_v18 = vpop.f32.mrf.mxu2  ;;  %v178_v19 = vpop.f32.mrf.mxu3 }
  0xa6   :  { %196 = vst [vmem:[%s425_s2 + $0x40] sm:$0xff] %v168_v18  ;;  %v150_v20 = vpop.f32.mrf.mxu0  ;;  %v160_v21 = vpop.f32.mrf.mxu1 }
  0xa7   :  { %200 = vst [vmem:[%s425_s2 + $0x60] sm:$0xff] %v178_v19 }
  0xa8   :  { %189 = vst [vmem:[%s425_s2 + $0x8] sm:$0xff] %v150_v20 }
  0xa9   :  { %193 = vst [vmem:[%s425_s2 + $0x28] sm:$0xff] %v160_v21 }
  0xad   :  { %v170_v22 = vpop.f32.mrf.mxu2  ;;  %v180_v23 = vpop.f32.mrf.mxu3 }
  0xae   :  { %197 = vst [vmem:[%s425_s2 + $0x48] sm:$0xff] %v170_v22  ;;  %v153_v24 = vpop.f32.mrf.mxu0  ;;  %v163_v25 = vpop.f32.mrf.mxu1 }
  0xaf   :  { %201 = vst [vmem:[%s425_s2 + $0x68] sm:$0xff] %v180_v23 }
  0xb0   :  { %190 = vst [vmem:[%s425_s2 + $0x10] sm:$0xff] %v153_v24 }
  0xb1   :  { %194 = vst [vmem:[%s425_s2 + $0x30] sm:$0xff] %v163_v25 }
  0xb5   :  { %v173_v26 = vpop.f32.mrf.mxu2  ;;  %v183_v27 = vpop.f32.mrf.mxu3 }
  0xb6   :  { %198 = vst [vmem:[%s425_s2 + $0x50] sm:$0xff] %v173_v26  ;;  %v155_v28 = vpop.f32.mrf.mxu0  ;;  %v165_v29 = vpop.f32.mrf.mxu1 }
  0xb7   :  { %202 = vst [vmem:[%s425_s2 + $0x70] sm:$0xff] %v183_v27 }
  0xb8   :  { %191 = vst [vmem:[%s425_s2 + $0x18] sm:$0xff] %v155_v28 }
  0xb9   :  { %195 = vst [vmem:[%s425_s2 + $0x38] sm:$0xff] %v165_v29 }
  0xbd   :  { %v175_v30 = vpop.f32.mrf.mxu2  ;;  %v185_v31 = vpop.f32.mrf.mxu3 }
  0xbe   :  { %199 = vst [vmem:[%s425_s2 + $0x58] sm:$0xff] %v175_v30 }
  0xbf   :  { %203 = vst [vmem:[%s425_s2 + $0x78] sm:$0xff] %v185_v31 }

// kernel: graph_convolution.3
= control target key start
LH: loop header
LB: loop body
LE: loop exit
PB: predicated region body
PF: predicated region fallthrough
CT: control target
= control target key end

     0   :  { %v391_v0 = vmov 0.0   ;;  %s519_s0 = inlined_call_operand.<no memory space> [shape: s32[1], index: 0, kind: input, shape index: {}]   ;;  %s520_s1 = inlined_call_operand.<no memory space> [shape: s32[1], index: 1, kind: input, shape index: {}]   ;;  %s521_s3 = inlined_call_operand.vmem [shape: f32[128,128], index: 3, kind: input, shape index: {}]   ;;  %s522_s4 = inlined_call_operand.vmem [shape: f32[1,128], index: 4, kind: input, shape index: {}]   ;;  %s523_s5 = inlined_call_operand.vmem [shape: f32[128,128], index: 5, kind: output, shape index: {}]   ;;  %s524_s2 = inlined_call_operand.vmem [shape: bf16[128,128], index: 2, kind: input, shape index: {}]  }
   0x1   :  { %11 = sst [smem:[#allocation5]] %s520_s1  ;;  %p34_p0 = scmp.lt.s32.totalorder %s520_s1, 0  ;;  %44 = vst [vmem:[#allocation2 + $0x30] sm:$0xff] %v391_v0 }
   0x2   :  { %45 = vst [vmem:[#allocation2] sm:$0xff] %v391_v0  ;;  %p323_p1 = scmp.le.s32.totalorder %s519_s0, 0 }
   0x3   :  { %s526_s1 = smov (!%p34_p0, %s520_s1), 0  ;;  %46 = vst [vmem:[#allocation2 + $0x58] sm:$0xff] %v391_v0 }
   0x4   :  { %47 = vst [vmem:[#allocation2 + $0x18] sm:$0xff] %v391_v0  ;;  %s321_s24 = sshll.u32 %s526_s1, 2  ;;  %s66_s1 = sld [smem:[#allocation5]] (!%p323_p1) }
   0x5   :  { %48 = vst [vmem:[#allocation2 + $0x50] sm:$0xff] %v391_v0  ;;  %s434_s27 = scalar_lea.vmem %s524_s2, %s321_s24 }
   0x6   :  { %49 = vst [vmem:[#allocation2 + $0x68] sm:$0xff] %v391_v0 }
   0x7   :  { %50 = vst [vmem:[#allocation2 + $0x8] sm:$0xff] %v391_v0 }
   0x8   :  { %51 = vst [vmem:[#allocation2 + $0x48] sm:$0xff] %v391_v0 }
   0x9   :  { %52 = vst [vmem:[#allocation2 + $0x40] sm:$0xff] %v391_v0 }
   0xa   :  { %53 = vst [vmem:[#allocation2 + $0x20] sm:$0xff] %v391_v0  ;;  %s324_s30 = sshll.u32 (!%p323_p1), %s66_s1, 7 }
   0xb   :  { %54 = vst [vmem:[#allocation2 + $0x10] sm:$0xff] %v391_v0  ;;  %s442_s7 = scalar_lea.vmem (!%p323_p1), %s521_s3, %s324_s30 }
   0xc   :  { %55 = vst [vmem:[#allocation2 + $0x38] sm:$0xff] %v391_v0  ;;  %64 = sbr.rel (%p323_p1) target bundleno = 212 (0xd4), region = 21 }
   0xd   :  { %56 = vst [vmem:[#allocation2 + $0x60] sm:$0xff] %v391_v0 }
   0xe   :  { %57 = vst [vmem:[#allocation2 + $0x70] sm:$0xff] %v391_v0 }
   0xf   :  { %58 = vst [vmem:[#allocation2 + $0x78] sm:$0xff] %v391_v0 }
  0x10   :  { %59 = vst [vmem:[#allocation2 + $0x28] sm:$0xff] %v391_v0 }
  0x11   :  { %v83_v1 = vld [vmem:[%s442_s7 + $0x70] sm:$0xff]  ;;  %v84_v2 = vld [vmem:[%s442_s7 + $0x78] sm:$0xff]  ;;  %v81_v3 = vld [vmem:[%s442_s7 + $0x60] sm:$0xff] }
  0x12   :  { %v124_v4 = vpack.c.bf16 %v84_v2, %v83_v1  ;;  %v82_v5 = vld [vmem:[%s442_s7 + $0x68] sm:$0xff]  ;;  %v79_v7 = vld [vmem:[%s442_s7 + $0x50] sm:$0xff]  ;;  %v80_v8 = vld [vmem:[%s442_s7 + $0x58] sm:$0xff] }
  0x13   :  { %v123_v6 = vpack.c.bf16 %v82_v5, %v81_v3  ;;  %v122_v9 = vpack.c.bf16 %v80_v8, %v79_v7  ;;  %v77_v10 = vld [vmem:[%s442_s7 + $0x40] sm:$0xff]  ;;  %v78_v11 = vld [vmem:[%s442_s7 + $0x48] sm:$0xff]  ;;  %v75_v13 = vld [vmem:[%s442_s7 + $0x30] sm:$0xff] }
  0x14   :  { %173 = vmatpush.bf16.msra.mxu0 %v124_v4  ;;  %365 = vmatpush.bf16.msra.mxu1 %v124_v4  ;;  %v121_v12 = vpack.c.bf16 %v78_v11, %v77_v10  ;;  %v76_v14 = vld [vmem:[%s442_s7 + $0x38] sm:$0xff]  ;;  %v73_v16 = vld [vmem:[%s442_s7 + $0x20] sm:$0xff]  ;;  %v74_v17 = vld [vmem:[%s442_s7 + $0x28] sm:$0xff] }
  0x15   :  { %366 = vmatpush.bf16.msra.mxu2 %v124_v4  ;;  %367 = vmatpush.bf16.msra.mxu3 %v124_v4  ;;  %v120_v15 = vpack.c.bf16 %v76_v14, %v75_v13  ;;  %v119_v18 = vpack.c.bf16 %v74_v17, %v73_v16  ;;  %v71_v19 = vld [vmem:[%s442_s7 + $0x10] sm:$0xff]  ;;  %v72_v20 = vld [vmem:[%s442_s7 + $0x18] sm:$0xff]  ;;  %v69_v22 = vld [vmem:[%s442_s7] sm:$0xff] }
  0x16   :  { %v118_v21 = vpack.c.bf16 %v72_v20, %v71_v19  ;;  %v70_v23 = vld [vmem:[%s442_s7 + $0x8] sm:$0xff]  ;;  %v357_v25 = vld [vmem:[%s434_s27] sm:$0xff]  ;;  %v359_v26 = vld [vmem:[%s434_s27 + $0x10] sm:$0xff] }
  0x17   :  { %v117_v24 = vpack.c.bf16 %v70_v23, %v69_v22  ;;  %v361_v27 = vld [vmem:[%s434_s27 + $0x20] sm:$0xff]  ;;  %v363_v28 = vld [vmem:[%s434_s27 + $0x30] sm:$0xff]  ;;  %v358_v29 = vld [vmem:[%s434_s27 + $0x8] sm:$0xff] }
  0x18   :  { %174 = vmatpush.bf16.msra.mxu0 %v123_v6  ;;  %368 = vmatpush.bf16.msra.mxu1 %v123_v6  ;;  %v360_v30 = vld [vmem:[%s434_s27 + $0x18] sm:$0xff]  ;;  %v362_v31 = vld [vmem:[%s434_s27 + $0x28] sm:$0xff]  ;;  %v85_v33 = vld [vmem:[#allocation2 + $0x30] sm:$0xff] }
  0x19   :  { %369 = vmatpush.bf16.msra.mxu2 %v123_v6  ;;  %370 = vmatpush.bf16.msra.mxu3 %v123_v6  ;;  %v364_v32 = vld [vmem:[%s434_s27 + $0x38] sm:$0xff]  ;;  %v89_v34 = vld [vmem:[#allocation2 + $0x50] sm:$0xff]  ;;  %v93_v39 = vld [vmem:[#allocation2 + $0x40] sm:$0xff] }
  0x1a   :  { %v97_v40 = vld [vmem:[#allocation2 + $0x60] sm:$0xff]  ;;  %v90_v42 = vld [vmem:[#allocation2 + $0x68] sm:$0xff]  ;;  %v98_v52 = vld [vmem:[#allocation2 + $0x70] sm:$0xff] }
  0x1b   :  { %v86_v41 = vld [vmem:[#allocation2] sm:$0xff]  ;;  %v87_v53 = vld [vmem:[#allocation2 + $0x58] sm:$0xff]  ;;  %v91_v54 = vld [vmem:[#allocation2 + $0x8] sm:$0xff] }
  0x1c   :  { %175 = vmatpush.bf16.msra.mxu0 %v122_v9  ;;  %371 = vmatpush.bf16.msra.mxu1 %v122_v9  ;;  %v94_v51 = vld [vmem:[#allocation2 + $0x20] sm:$0xff]  ;;  %v95_v63 = vld [vmem:[#allocation2 + $0x10] sm:$0xff]  ;;  %v99_v0 = vld [vmem:[#allocation2 + $0x78] sm:$0xff] }
  0x1d   :  { %372 = vmatpush.bf16.msra.mxu2 %v122_v9  ;;  %373 = vmatpush.bf16.msra.mxu3 %v122_v9  ;;  %v88_v1 = vld [vmem:[#allocation2 + $0x18] sm:$0xff]  ;;  %v92_v2 = vld [vmem:[#allocation2 + $0x48] sm:$0xff] }
  0x1e   :  { %v96_v11 = vld [vmem:[#allocation2 + $0x38] sm:$0xff] }
  0x20   :  { %176 = vmatpush.bf16.msra.mxu0 %v121_v12  ;;  %374 = vmatpush.bf16.msra.mxu1 %v121_v12 }
  0x21   :  { %375 = vmatpush.bf16.msra.mxu2 %v121_v12  ;;  %376 = vmatpush.bf16.msra.mxu3 %v121_v12  ;;  %v100_v12 = vld [vmem:[#allocation2 + $0x28] sm:$0xff] }
  0x24   :  { %177 = vmatpush.bf16.msra.mxu0 %v120_v15  ;;  %377 = vmatpush.bf16.msra.mxu1 %v120_v15 }
  0x25   :  { %378 = vmatpush.bf16.msra.mxu2 %v120_v15  ;;  %379 = vmatpush.bf16.msra.mxu3 %v120_v15 }
  0x28   :  { %178 = vmatpush.bf16.msra.mxu0 %v119_v18  ;;  %380 = vmatpush.bf16.msra.mxu1 %v119_v18 }
  0x29   :  { %381 = vmatpush.bf16.msra.mxu2 %v119_v18  ;;  %382 = vmatpush.bf16.msra.mxu3 %v119_v18 }
  0x2c   :  { %179 = vmatpush.bf16.msra.mxu0 %v118_v21  ;;  %383 = vmatpush.bf16.msra.mxu1 %v118_v21 }
  0x2d   :  { %384 = vmatpush.bf16.msra.mxu2 %v118_v21  ;;  %385 = vmatpush.bf16.msra.mxu3 %v118_v21 }
  0x30   :  { %180 = vmatpush.bf16.msra.mxu0 %v117_v24  ;;  %386 = vmatpush.bf16.msra.mxu1 %v117_v24 }
  0x31   :  { %387 = vmatpush.bf16.msra.mxu2 %v117_v24  ;;  %388 = vmatpush.bf16.msra.mxu3 %v117_v24 }
  0x33   :  { %181 = vmatmul.bf16.vlgmr.msra.gmra.mxu0 %v357_v25  ;;  %191 = vmatmul.bf16.vlgmr.msra.gmra.mxu1 %v359_v26 }
  0x34   :  { %201 = vmatmul.bf16.vlgmr.msra.gmra.mxu2 %v361_v27  ;;  %211 = vmatmul.bf16.vlgmr.msra.gmra.mxu3 %v363_v28 }
  0x43   :  { %186 = vmatmul.bf16.gmra.mxu0 %v358_v29  ;;  %196 = vmatmul.bf16.gmra.mxu1 %v360_v30 }
  0x44   :  { %206 = vmatmul.bf16.gmra.mxu2 %v362_v31  ;;  %216 = vmatmul.bf16.gmra.mxu3 %v364_v32 }
  0xb0   :  { %v182_v35 = vpop.f32.mrf.mxu0  ;;  %v192_v36 = vpop.f32.mrf.mxu1 }
  0xb1   :  { %v222_v37 = vadd.f32 %v182_v35, %v85_v33  ;;  %v226_v38 = vadd.f32 %v192_v36, %v89_v34 }
  0xb3   :  { %238 = vst [vmem:[#allocation2 + $0x30] sm:$0xff] %v222_v37 }
  0xb4   :  { %242 = vst [vmem:[#allocation2 + $0x50] sm:$0xff] %v226_v38 }
  0xb7   :  { %v202_v43 = vpop.f32.mrf.mxu2  ;;  %v212_v44 = vpop.f32.mrf.mxu3 }
  0xb8   :  { %v230_v45 = vadd.f32 %v202_v43, %v93_v39  ;;  %v234_v46 = vadd.f32 %v212_v44, %v97_v40  ;;  %v184_v47 = vpop.f32.mrf.mxu0  ;;  %v194_v48 = vpop.f32.mrf.mxu1 }
  0xb9   :  { %v223_v49 = vadd.f32 %v184_v47, %v86_v41  ;;  %v227_v50 = vadd.f32 %v194_v48, %v90_v42 }
  0xba   :  { %246 = vst [vmem:[#allocation2 + $0x40] sm:$0xff] %v230_v45 }
  0xbb   :  { %250 = vst [vmem:[#allocation2 + $0x60] sm:$0xff] %v234_v46 }
  0xbc   :  { %239 = vst [vmem:[#allocation2] sm:$0xff] %v223_v49 }
  0xbd   :  { %243 = vst [vmem:[#allocation2 + $0x68] sm:$0xff] %v227_v50 }
  0xbf   :  { %v204_v55 = vpop.f32.mrf.mxu2  ;;  %v214_v56 = vpop.f32.mrf.mxu3 }
  0xc0   :  { %v231_v57 = vadd.f32 %v204_v55, %v94_v51  ;;  %v235_v58 = vadd.f32 %v214_v56, %v98_v52  ;;  %v187_v59 = vpop.f32.mrf.mxu0  ;;  %v197_v60 = vpop.f32.mrf.mxu1 }
  0xc1   :  { %v224_v61 = vadd.f32 %v187_v59, %v87_v53  ;;  %v228_v62 = vadd.f32 %v197_v60, %v91_v54 }
  0xc2   :  { %247 = vst [vmem:[#allocation2 + $0x20] sm:$0xff] %v231_v57 }
  0xc3   :  { %251 = vst [vmem:[#allocation2 + $0x70] sm:$0xff] %v235_v58 }
  0xc4   :  { %240 = vst [vmem:[#allocation2 + $0x58] sm:$0xff] %v224_v61 }
  0xc5   :  { %244 = vst [vmem:[#allocation2 + $0x8] sm:$0xff] %v228_v62 }
  0xc7   :  { %v207_v3 = vpop.f32.mrf.mxu2  ;;  %v217_v4 = vpop.f32.mrf.mxu3 }
  0xc8   :  { %v232_v5 = vadd.f32 %v207_v3, %v95_v63  ;;  %v236_v6 = vadd.f32 %v217_v4, %v99_v0  ;;  %v189_v7 = vpop.f32.mrf.mxu0  ;;  %v199_v8 = vpop.f32.mrf.mxu1 }
  0xc9   :  { %v225_v9 = vadd.f32 %v189_v7, %v88_v1  ;;  %v229_v10 = vadd.f32 %v199_v8, %v92_v2 }
  0xca   :  { %248 = vst [vmem:[#allocation2 + $0x10] sm:$0xff] %v232_v5 }
  0xcb   :  { %252 = vst [vmem:[#allocation2 + $0x78] sm:$0xff] %v236_v6 }
  0xcc   :  { %241 = vst [vmem:[#allocation2 + $0x18] sm:$0xff] %v225_v9 }
  0xcd   :  { %245 = vst [vmem:[#allocation2 + $0x48] sm:$0xff] %v229_v10 }
  0xcf   :  { %v209_v13 = vpop.f32.mrf.mxu2  ;;  %v219_v14 = vpop.f32.mrf.mxu3 }
  0xd0   :  { %v233_v15 = vadd.f32 %v209_v13, %v96_v11  ;;  %v237_v16 = vadd.f32 %v219_v14, %v100_v12 }
  0xd2   :  { %249 = vst [vmem:[#allocation2 + $0x38] sm:$0xff] %v233_v15 }
  0xd3   :  { %253 = vst [vmem:[#allocation2 + $0x28] sm:$0xff] %v237_v16 }
  0xd4 PF:  { %v257_v17 = vld [vmem:[#allocation2 + $0x30] sm:$0xff]  ;;  %v390_v18 = vld [vmem:[%s522_s4] ss:$0 sm:$0xff]  ;;  %v259_v20 = vld [vmem:[#allocation2 + $0x58] sm:$0xff] }
  0xd5   :  { %v258_v19 = vld [vmem:[#allocation2] sm:$0xff]  ;;  %v260_v21 = vld [vmem:[#allocation2 + $0x18] sm:$0xff]  ;;  %v277_v22 = vadd.f32 %v390_v18, %v257_v17  ;;  %v279_v24 = vadd.f32 %v390_v18, %v259_v20  ;;  %v261_v25 = vld [vmem:[#allocation2 + $0x50] sm:$0xff] }
  0xd6   :  { %v278_v23 = vadd.f32 %v390_v18, %v258_v19  ;;  %v262_v26 = vld [vmem:[#allocation2 + $0x68] sm:$0xff]  ;;  %v280_v27 = vadd.f32 %v390_v18, %v260_v21  ;;  %v281_v29 = vadd.f32 %v390_v18, %v261_v25  ;;  %v265_v32 = vld [vmem:[#allocation2 + $0x40] sm:$0xff]  ;;  %v267_v36 = vld [vmem:[#allocation2 + $0x10] sm:$0xff] }
  0xd7   :  { %v263_v28 = vld [vmem:[#allocation2 + $0x8] sm:$0xff]  ;;  %293 = vst [vmem:[%s523_s5] sm:$0xff] %v277_v22  ;;  %v282_v31 = vadd.f32 %v390_v18, %v262_v26  ;;  %v266_v34 = vld [vmem:[#allocation2 + $0x20] sm:$0xff]  ;;  %v285_v37 = vadd.f32 %v390_v18, %v265_v32  ;;  %v287_v41 = vadd.f32 %v390_v18, %v267_v36 }
  0xd8   :  { %v264_v30 = vld [vmem:[#allocation2 + $0x48] sm:$0xff]  ;;  %294 = vst [vmem:[%s523_s5 + $0x8] sm:$0xff] %v278_v23  ;;  %v283_v33 = vadd.f32 %v390_v18, %v263_v28  ;;  %v286_v39 = vadd.f32 %v390_v18, %v266_v34  ;;  %v269_v40 = vld [vmem:[#allocation2 + $0x60] sm:$0xff]  ;;  %v270_v42 = vld [vmem:[#allocation2 + $0x70] sm:$0xff] }
  0xd9   :  { %295 = vst [vmem:[%s523_s5 + $0x10] sm:$0xff] %v279_v24  ;;  %v284_v35 = vadd.f32 %v390_v18, %v264_v30  ;;  %v268_v38 = vld [vmem:[#allocation2 + $0x38] sm:$0xff]  ;;  %v289_v45 = vadd.f32 %v390_v18, %v269_v40  ;;  %v290_v47 = vadd.f32 %v390_v18, %v270_v42 }
  0xda   :  { %296 = vst [vmem:[%s523_s5 + $0x18] sm:$0xff] %v280_v27  ;;  %v288_v43 = vadd.f32 %v390_v18, %v268_v38  ;;  %v271_v44 = vld [vmem:[#allocation2 + $0x78] sm:$0xff]  ;;  %v272_v46 = vld [vmem:[#allocation2 + $0x28] sm:$0xff] }
  0xdb   :  { %297 = vst [vmem:[%s523_s5 + $0x20] sm:$0xff] %v281_v29  ;;  %v291_v48 = vadd.f32 %v390_v18, %v271_v44  ;;  %v292_v49 = vadd.f32 %v390_v18, %v272_v46 }
  0xdc   :  { %298 = vst [vmem:[%s523_s5 + $0x28] sm:$0xff] %v282_v31 }
  0xdd   :  { %299 = vst [vmem:[%s523_s5 + $0x30] sm:$0xff] %v283_v33 }
  0xde   :  { %300 = vst [vmem:[%s523_s5 + $0x38] sm:$0xff] %v284_v35 }
  0xdf   :  { %301 = vst [vmem:[%s523_s5 + $0x40] sm:$0xff] %v285_v37 }
  0xe0   :  { %302 = vst [vmem:[%s523_s5 + $0x48] sm:$0xff] %v286_v39 }
  0xe1   :  { %303 = vst [vmem:[%s523_s5 + $0x50] sm:$0xff] %v287_v41 }
  0xe2   :  { %304 = vst [vmem:[%s523_s5 + $0x58] sm:$0xff] %v288_v43 }
  0xe3   :  { %305 = vst [vmem:[%s523_s5 + $0x60] sm:$0xff] %v289_v45 }
  0xe4   :  { %306 = vst [vmem:[%s523_s5 + $0x68] sm:$0xff] %v290_v47 }
  0xe5   :  { %307 = vst [vmem:[%s523_s5 + $0x70] sm:$0xff] %v291_v48 }
  0xe6   :  { %308 = vst [vmem:[%s523_s5 + $0x78] sm:$0xff] %v292_v49 }

</bundles_post_ra>
